<compile_context>
chip_gen: v6e
topology: v6e:2x2x1
jax: 0.10.0
libtpu: 0.0.40
codegen_flags: <defaults>
</compile_context>

<pallas_src>
import functools

import jax
import jax.numpy as jnp
import numpy as np
from jax.experimental import pallas as pl
from jax.experimental.pallas import tpu as pltpu


def _round_up(x, mult):
    return (x + mult - 1) // mult * mult


def _mod2(s):
    # s is an exact non-negative integer held in f32 -> exact mod-2.
    return s - 2.0 * jnp.floor(0.5 * s)


def _ecc_kernel(n_pad, g_ref, ht_ref, m_ref, z_ref, out_ref):
    # ---- encode: x_bits = (m @ G) mod 2  (MXU, f32 accumulate, exact) ----
    s = jnp.dot(m_ref[...], g_ref[...], preferred_element_type=jnp.float32)
    x_bits = _mod2(s)                    # (TB, n_pad)  in {0,1}
    x = 1.0 - 2.0 * x_bits               # bin_to_sign -> +/-1 codeword

    # ---- channel ----
    z = z_ref[...]                       # (TB, n_pad) f32
    z_mul = (x + z) * x                  # ((x + z) * x).detach()
    y = x * z_mul

    # Binarization(y): y >= 0 -> +1 (bit 0), y < 0 -> -1 (bit 1)
    y_bits = (y < 0.0).astype(jnp.float32)

    # ---- syndrome: (y_bits @ H^T) mod 2, then bin_to_sign ----
    s2 = jnp.dot(y_bits.astype(jnp.bfloat16), ht_ref[...],
                 preferred_element_type=jnp.float32)
    synd_pm = 1.0 - 2.0 * _mod2(s2)      # (TB, n_pad), real part is first r lanes

    # ---- lane-dense packed stores (128-aligned, unmasked vst) ----
    out_ref[:, 0 * n_pad:1 * n_pad] = x_bits
    out_ref[:, 1 * n_pad:2 * n_pad] = y
    out_ref[:, 2 * n_pad:3 * n_pad] = jnp.abs(y)
    out_ref[:, 3 * n_pad:4 * n_pad] = z_mul
    out_ref[:, 4 * n_pad:5 * n_pad] = synd_pm


def prepare_code_matrices(P_matrix):
    """Build G, H, Ht once per model (depends only on P_matrix)."""
    r, k = P_matrix.shape
    binP = 0.5 * (1.0 - jnp.where(P_matrix >= 0.0, 1.0, -1.0))                # (r, k)
    H = jnp.concatenate([jnp.eye(r, dtype=jnp.float32), binP], axis=1)        # (r, n)
    G = jnp.concatenate([binP, jnp.eye(k, dtype=jnp.float32)], axis=0).T      # (k, n)
    Ht = H.T                                                                  # (n, r)
    return G, H, Ht


@functools.partial(jax.jit, static_argnames=("tb",))
def e2e_dc_ecct_forward(G, Ht, m, z, *, tb=256):
    """Forward pass of E2E_DC_ECC_Transformer up to (but not including) self.decoder.

    Returns (magnitude, syndrome_pm, x_bits, y, z_mul).
    """
    k, n = G.shape
    r = Ht.shape[1]
    B = m.shape[0]

    # MXU / lane-friendly padding (zeros do not change the parity sums).
    n_pad = _round_up(n, 128)
    k_pad = _round_up(k, 128)
    # Batch tile: multiple of 8 sublanes, capped so (in + out blocks) * 2 buffers
    # stays far below even v7x's 64 MiB VMEM.
    TB = min(tb, _round_up(B, 8))
    B_pad = _round_up(B, TB)

    # Matmul operands in bf16 ({0,1} values are exact; accumulation stays f32).
    G_pad = jnp.zeros((k_pad, n_pad), jnp.bfloat16).at[:k, :n].set(
        G.astype(jnp.bfloat16))
    Ht_pad = jnp.zeros((n_pad, n_pad), jnp.bfloat16).at[:n, :r].set(
        Ht.astype(jnp.bfloat16))
    m_pad = jnp.zeros((B_pad, k_pad), jnp.bfloat16).at[:B, :k].set(
        m.astype(jnp.bfloat16))
    z_pad = jnp.zeros((B_pad, n_pad), jnp.float32).at[:B, :n].set(
        z.astype(jnp.float32))

    kernel = functools.partial(_ecc_kernel, n_pad)
    grid = (B_pad // TB,)

    slab = pl.pallas_call(
        kernel,
        grid=grid,
        out_shape=jax.ShapeDtypeStruct((B_pad, 5 * n_pad), jnp.float32),
        in_specs=[
            pl.BlockSpec((k_pad, n_pad), lambda i: (0, 0)),   # G   (grid-invariant)
            pl.BlockSpec((n_pad, n_pad), lambda i: (0, 0)),   # Ht  (grid-invariant)
            pl.BlockSpec((TB, k_pad), lambda i: (i, 0)),      # m   (batch-tiled)
            pl.BlockSpec((TB, n_pad), lambda i: (i, 0)),      # z   (batch-tiled)
        ],
        out_specs=pl.BlockSpec((TB, 5 * n_pad), lambda i: (i, 0)),
        compiler_params=pltpu.CompilerParams(
            dimension_semantics=("parallel",)),
    )(G_pad, Ht_pad, m_pad, z_pad)

    x_bits = slab[:B, 0 * n_pad:0 * n_pad + n]
    y = slab[:B, 1 * n_pad:1 * n_pad + n]
    magnitude = slab[:B, 2 * n_pad:2 * n_pad + n]
    z_mul = slab[:B, 3 * n_pad:3 * n_pad + n]
    syndrome_pm = slab[:B, 4 * n_pad:4 * n_pad + r]

    # TODO(synk): `self.decoder` is an external, undefined module in the reference;
    # we return its inputs (magnitude, syndrome, z_mul, y) and sign_to_bin(x)
    # instead of (loss, x_pred, sign_to_bin(x)).
    return magnitude, syndrome_pm, x_bits, y, z_mul


def _ref_forward(P_matrix, m, z):
    """Pure-JAX reference reproducing the PyTorch math, for verification."""
    r, k = P_matrix.shape
    binP = 0.5 * (1.0 - jnp.where(P_matrix >= 0.0, 1.0, -1.0))
    H = jnp.concatenate([jnp.eye(r, dtype=jnp.float32), binP], axis=1)
    G = jnp.concatenate([binP, jnp.eye(k, dtype=jnp.float32)], axis=0).T
    tmp = 1.0 - 2.0 * (G[None, :, :] * m[:, :, None])
    x_bits = 0.5 * (1.0 - jnp.prod(tmp, axis=1))
    x = 1.0 - 2.0 * x_bits
    z_mul = (x + z) * x
    y = x * z_mul
    y_bits = 0.5 * (1.0 - jnp.where(y >= 0.0, 1.0, -1.0))
    tmp2 = 1.0 - 2.0 * (H[None, :, :] * y_bits[:, None, :])
    synd_pm = 1.0 - 2.0 * (0.5 * (1.0 - jnp.prod(tmp2, axis=2)))
    return jnp.abs(y), synd_pm, x_bits, y, z_mul


if __name__ == "__main__":
    B, n, k = 8, 32, 16
    r = n - k

    key = jax.random.PRNGKey(0)
    kp, km, kz = jax.random.split(key, 3)

    # __init__: P_matrix = bin_to_sign(randint(0, 2, (n-k, k))) * 0.01
    P_bits = jax.random.randint(kp, (r, k), 0, 2).astype(jnp.float32)
    P_matrix = (1.0 - 2.0 * P_bits) * 0.01

    m = jax.random.randint(km, (B, k), 0, 2).astype(jnp.float32)   # message bits
    z = 0.5 * jax.random.normal(kz, (B, n), dtype=jnp.float32)      # channel noise

    # Code matrices are built once per model (depend only on P_matrix).
    G, H, Ht = prepare_code_matrices(P_matrix)

    outs = e2e_dc_ecct_forward(G, Ht, m, z)
    outs = jax.block_until_ready(outs)
    magnitude, syndrome_pm, x_bits, y, z_mul = outs

    ref_mag, ref_synd, ref_xbits, ref_y, ref_zmul = _ref_forward(P_matrix, m, z)
    np.testing.assert_allclose(np.asarray(magnitude), np.asarray(ref_mag), atol=1e-5)
    np.testing.assert_allclose(np.asarray(syndrome_pm), np.asarray(ref_synd), atol=1e-5)
    np.testing.assert_allclose(np.asarray(x_bits), np.asarray(ref_xbits), atol=1e-5)
    np.testing.assert_allclose(np.asarray(y), np.asarray(ref_y), atol=1e-5)
    np.testing.assert_allclose(np.asarray(z_mul), np.asarray(ref_zmul), atol=1e-5)

    print("KERNEL_OK")
</pallas_src>

<mosaic_0001>
module attributes {stable_mosaic.version = 11 : i64} {
  func.func @_ecc_kernel(%arg0: i32, %arg1: memref<128x128xbf16, #tpu.memory_space<vmem>>, %arg2: memref<128x128xbf16, #tpu.memory_space<vmem>>, %arg3: memref<8x128xbf16, #tpu.memory_space<vmem>>, %arg4: memref<8x128xf32, #tpu.memory_space<vmem>>, %arg5: memref<8x640xf32, #tpu.memory_space<vmem>>) attributes {dimension_semantics = [#tpu.dimension_semantics<parallel>], iteration_bounds = array<i64: 1>, scalar_prefetch = 0 : i64, scratch_operands = 0 : i64, tpu.core_type = #tpu.core_type<tc>, window_params = [{pipeline_mode = #tpu.pipeline_mode<synchronous>, transform_indices = @transform_0, window_bounds = array<i64: 128, 128>}, {pipeline_mode = #tpu.pipeline_mode<synchronous>, transform_indices = @transform_1, window_bounds = array<i64: 128, 128>}, {transform_indices = @transform_2, window_bounds = array<i64: 8, 128>}, {transform_indices = @transform_3, window_bounds = array<i64: 8, 128>}, {transform_indices = @transform_4, window_bounds = array<i64: 8, 640>}]} {
    %c0 = arith.constant 0 : index
    %c0_0 = arith.constant 0 : index
    %0 = vector.load %arg3[%c0, %c0_0] : memref<8x128xbf16, #tpu.memory_space<vmem>>, vector<8x128xbf16>
    %c0_1 = arith.constant 0 : index
    %c0_2 = arith.constant 0 : index
    %1 = vector.load %arg1[%c0_1, %c0_2] : memref<128x128xbf16, #tpu.memory_space<vmem>>, vector<128x128xbf16>
    %cst = arith.constant dense<0.000000e+00> : vector<8x128xf32>
    %2 = tpu.matmul %0, %1, %cst {dimension_numbers = #tpu.dot_dimension_numbers<[1], [0], [0], [1], [0, 0, 1, 1], [], []>} : vector<8x128xbf16>, vector<128x128xbf16>, vector<8x128xf32> -> vector<8x128xf32>
    %cst_3 = arith.constant 5.000000e-01 : f32
    %3 = vector.broadcast %cst_3 : f32 to vector<8x128xf32>
    %4 = arith.mulf %3, %2 : vector<8x128xf32>
    %5 = math.floor %4 : vector<8x128xf32>
    %cst_4 = arith.constant 2.000000e+00 : f32
    %6 = vector.broadcast %cst_4 : f32 to vector<8x128xf32>
    %7 = arith.mulf %6, %5 : vector<8x128xf32>
    %8 = arith.subf %2, %7 : vector<8x128xf32>
    %cst_5 = arith.constant 2.000000e+00 : f32
    %9 = vector.broadcast %cst_5 : f32 to vector<8x128xf32>
    %10 = arith.mulf %9, %8 : vector<8x128xf32>
    %cst_6 = arith.constant 1.000000e+00 : f32
    %11 = vector.broadcast %cst_6 : f32 to vector<8x128xf32>
    %12 = arith.subf %11, %10 : vector<8x128xf32>
    %c0_7 = arith.constant 0 : index
    %c0_8 = arith.constant 0 : index
    %13 = vector.load %arg4[%c0_7, %c0_8] : memref<8x128xf32, #tpu.memory_space<vmem>>, vector<8x128xf32>
    %14 = arith.addf %12, %13 : vector<8x128xf32>
    %15 = arith.mulf %14, %12 : vector<8x128xf32>
    %16 = arith.mulf %12, %15 : vector<8x128xf32>
    %cst_9 = arith.constant 0.000000e+00 : f32
    %17 = vector.broadcast %cst_9 : f32 to vector<8x128xf32>
    %18 = arith.cmpf olt, %16, %17 : vector<8x128xf32>
    %19 = arith.extui %18 : vector<8x128xi1> to vector<8x128xi32>
    %20 = arith.sitofp %19 : vector<8x128xi32> to vector<8x128xf32>
    %21 = arith.truncf %20 : vector<8x128xf32> to vector<8x128xbf16>
    %c0_10 = arith.constant 0 : index
    %c0_11 = arith.constant 0 : index
    %22 = vector.load %arg2[%c0_10, %c0_11] : memref<128x128xbf16, #tpu.memory_space<vmem>>, vector<128x128xbf16>
    %cst_12 = arith.constant dense<0.000000e+00> : vector<8x128xf32>
    %23 = tpu.matmul %21, %22, %cst_12 {dimension_numbers = #tpu.dot_dimension_numbers<[1], [0], [0], [1], [0, 0, 1, 1], [], []>} : vector<8x128xbf16>, vector<128x128xbf16>, vector<8x128xf32> -> vector<8x128xf32>
    %cst_13 = arith.constant 5.000000e-01 : f32
    %24 = vector.broadcast %cst_13 : f32 to vector<8x128xf32>
    %25 = arith.mulf %24, %23 : vector<8x128xf32>
    %26 = math.floor %25 : vector<8x128xf32>
    %cst_14 = arith.constant 2.000000e+00 : f32
    %27 = vector.broadcast %cst_14 : f32 to vector<8x128xf32>
    %28 = arith.mulf %27, %26 : vector<8x128xf32>
    %29 = arith.subf %23, %28 : vector<8x128xf32>
    %cst_15 = arith.constant 2.000000e+00 : f32
    %30 = vector.broadcast %cst_15 : f32 to vector<8x128xf32>
    %31 = arith.mulf %30, %29 : vector<8x128xf32>
    %cst_16 = arith.constant 1.000000e+00 : f32
    %32 = vector.broadcast %cst_16 : f32 to vector<8x128xf32>
    %33 = arith.subf %32, %31 : vector<8x128xf32>
    %c0_17 = arith.constant 0 : index
    %c0_18 = arith.constant 0 : index
    %34 = vector.load %arg5[%c0_17, %c0_18] : memref<8x640xf32, #tpu.memory_space<vmem>>, vector<8x128xf32>
    tpu.vector_store %arg5[%c0_17, %c0_18], %8 {strides = array<i32>} : memref<8x640xf32, #tpu.memory_space<vmem>>, vector<8x128xf32>,
    %c0_19 = arith.constant 0 : index
    %c128 = arith.constant 128 : index
    %35 = vector.load %arg5[%c0_19, %c128] : memref<8x640xf32, #tpu.memory_space<vmem>>, vector<8x128xf32>
    tpu.vector_store %arg5[%c0_19, %c128], %16 {strides = array<i32>} : memref<8x640xf32, #tpu.memory_space<vmem>>, vector<8x128xf32>,
    %36 = math.absf %16 : vector<8x128xf32>
    %c0_20 = arith.constant 0 : index
    %c256 = arith.constant 256 : index
    %37 = vector.load %arg5[%c0_20, %c256] : memref<8x640xf32, #tpu.memory_space<vmem>>, vector<8x128xf32>
    tpu.vector_store %arg5[%c0_20, %c256], %36 {strides = array<i32>} : memref<8x640xf32, #tpu.memory_space<vmem>>, vector<8x128xf32>,
    %c0_21 = arith.constant 0 : index
    %c384 = arith.constant 384 : index
    %38 = vector.load %arg5[%c0_21, %c384] : memref<8x640xf32, #tpu.memory_space<vmem>>, vector<8x128xf32>
    tpu.vector_store %arg5[%c0_21, %c384], %15 {strides = array<i32>} : memref<8x640xf32, #tpu.memory_space<vmem>>, vector<8x128xf32>,
    %c0_22 = arith.constant 0 : index
    %c512 = arith.constant 512 : index
    %39 = vector.load %arg5[%c0_22, %c512] : memref<8x640xf32, #tpu.memory_space<vmem>>, vector<8x128xf32>
    tpu.vector_store %arg5[%c0_22, %c512], %33 {strides = array<i32>} : memref<8x640xf32, #tpu.memory_space<vmem>>, vector<8x128xf32>,
    return
  }
  func.func @transform_0(%arg0: i32) -> (i32, i32) {
    %c0_i32 = arith.constant 0 : i32
    %c0_i32_0 = arith.constant 0 : i32
    %c0_i32_1 = arith.constant 0 : i32
    return %c0_i32, %c0_i32_0 : i32, i32
  }
  func.func @transform_1(%arg0: i32) -> (i32, i32) {
    %c0_i32 = arith.constant 0 : i32
    %c0_i32_0 = arith.constant 0 : i32
    %c0_i32_1 = arith.constant 0 : i32
    return %c0_i32, %c0_i32_0 : i32, i32
  }
  func.func @transform_2(%arg0: i32) -> (i32, i32) {
    %c0_i32 = arith.constant 0 : i32
    %c0_i32_0 = arith.constant 0 : i32
    return %arg0, %c0_i32 : i32, i32
  }
  func.func @transform_3(%arg0: i32) -> (i32, i32) {
    %c0_i32 = arith.constant 0 : i32
    %c0_i32_0 = arith.constant 0 : i32
    return %arg0, %c0_i32 : i32, i32
  }
  func.func @transform_4(%arg0: i32) -> (i32, i32) {
    %c0_i32 = arith.constant 0 : i32
    %c0_i32_0 = arith.constant 0 : i32
    return %arg0, %c0_i32 : i32, i32
  }
}

</mosaic_0001>

<bundles_post_ra>
// kernel: e2e_dc_ecct_forward.1
= control target key start
LH: loop header
LB: loop body
LE: loop exit
PB: predicated region body
PF: predicated region fallthrough
CT: control target
= control target key end

     0   :  { %v353_v0 = vmov 0.0   ;;  %vm354_vm0 = vmmov 0   ;;  %v355_v33 = vmov 1.0|1.0   ;;  %s450_s0 = inlined_call_operand.vmem [shape: bf16[128,128], index: 0, kind: input, shape index: {}]   ;;  %s451_s1 = inlined_call_operand.vmem [shape: bf16[128,128], index: 1, kind: input, shape index: {}]   ;;  %s452_s2 = inlined_call_operand.vmem [shape: bf16[8,128], index: 2, kind: input, shape index: {}]   ;;  %s453_s4 = inlined_call_operand.vmem [shape: f32[8,640], index: 4, kind: output, shape index: {}]   ;;  %s454_s3 = inlined_call_operand.vmem [shape: f32[8,128], index: 3, kind: input, shape index: {}]  }
   0x1   :  { %294 = vmatprep.subr.bf16.mxu0 %v353_v0  ;;  %v337_v1 = vld [vmem:[%s450_s0 + $0x38] sm:$0xff]   ;;  %310 = vmatprep.mubr.msk.bf16.mxu0 %vm354_vm0, %v353_v0  ;;  %v338_v2 = vld [vmem:[%s450_s0 + $0x30] sm:$0xff]   ;;  %v339_v3 = vld [vmem:[%s450_s0 + $0x28] sm:$0xff]  }
   0x2   :  { %314 = vmatprep.subr.bf16.mxu1 %v353_v0  ;;  %330 = vmatprep.mubr.msk.bf16.mxu1 %vm354_vm0, %v353_v0  ;;  %v345_v4 = vld [vmem:[%s451_s1 + $0x38] sm:$0xff]   ;;  %v340_v5 = vld [vmem:[%s450_s0 + $0x20] sm:$0xff]   ;;  %v346_v6 = vld [vmem:[%s451_s1 + $0x30] sm:$0xff]  }
   0x3   :  { %295 = vmatpush3.bf16.msra.mxu0 %v337_v1  ;;  %315 = vmatpush3.bf16.msra.mxu1 %v345_v4  ;;  %v341_v7 = vld [vmem:[%s450_s0 + $0x18] sm:$0xff]   ;;  %v347_v8 = vld [vmem:[%s451_s1 + $0x28] sm:$0xff]   ;;  %v342_v9 = vld [vmem:[%s450_s0 + $0x10] sm:$0xff]  }
   0x4   :  { %296 = vmatprep.subr.bf16.mxu0 %v353_v0  ;;  %316 = vmatprep.subr.bf16.mxu1 %v353_v0  ;;  %v343_v10 = vld [vmem:[%s450_s0 + $0x8] sm:$0xff]   ;;  %v344_v11 = vld [vmem:[%s450_s0] sm:$0xff]   ;;  %v349_v14 = vld [vmem:[%s451_s1 + $0x18] sm:$0xff]  }
   0x5   :  { %v18_v12 = vld [vmem:[%s452_s2] sm:$0xf]  ;;  %v350_v15 = vld [vmem:[%s451_s1 + $0x10] sm:$0xff]   ;;  %v351_v16 = vld [vmem:[%s451_s1 + $0x8] sm:$0xff]  }
   0x6   :  { %v348_v13 = vld [vmem:[%s451_s1 + $0x20] sm:$0xff]  }
   0x7   :  { %297 = vmatpush3.bf16.msra.mxu0 %v338_v2  ;;  %317 = vmatpush3.bf16.msra.mxu1 %v346_v6  ;;  %v352_v17 = vld [vmem:[%s451_s1] sm:$0xff]  }
   0x8   :  { %298 = vmatprep.subr.bf16.mxu0 %v353_v0  ;;  %318 = vmatprep.subr.bf16.mxu1 %v353_v0  ;;  %v129_v27 = vld [vmem:[%s454_s3] sm:$0xff] }
   0xb   :  { %299 = vmatpush3.bf16.msra.mxu0 %v339_v3  ;;  %319 = vmatpush3.bf16.msra.mxu1 %v347_v8 }
   0xc   :  { %300 = vmatprep.subr.bf16.mxu0 %v353_v0  ;;  %320 = vmatprep.subr.bf16.mxu1 %v353_v0 }
   0xf   :  { %301 = vmatpush3.bf16.msra.mxu0 %v340_v5  ;;  %321 = vmatpush3.bf16.msra.mxu1 %v348_v13 }
  0x10   :  { %302 = vmatprep.subr.bf16.mxu0 %v353_v0  ;;  %322 = vmatprep.subr.bf16.mxu1 %v353_v0 }
  0x13   :  { %303 = vmatpush3.bf16.msra.mxu0 %v341_v7  ;;  %323 = vmatpush3.bf16.msra.mxu1 %v349_v14 }
  0x14   :  { %304 = vmatprep.subr.bf16.mxu0 %v353_v0  ;;  %324 = vmatprep.subr.bf16.mxu1 %v353_v0 }
  0x17   :  { %305 = vmatpush3.bf16.msra.mxu0 %v342_v9  ;;  %325 = vmatpush3.bf16.msra.mxu1 %v350_v15 }
  0x18   :  { %306 = vmatprep.subr.bf16.mxu0 %v353_v0  ;;  %326 = vmatprep.subr.bf16.mxu1 %v353_v0 }
  0x1b   :  { %307 = vmatpush3.bf16.msra.mxu0 %v343_v10  ;;  %327 = vmatpush3.bf16.msra.mxu1 %v351_v16 }
  0x1c   :  { %308 = vmatprep.subr.bf16.mxu0 %v353_v0  ;;  %328 = vmatprep.subr.bf16.mxu1 %v353_v0 }
  0x1f   :  { %309 = vmatpush3.bf16.msra.mxu0 %v344_v11  ;;  %329 = vmatpush3.bf16.msra.mxu1 %v352_v17 }
  0x22   :  { %311 = vmatmul.mubr.bf16.vlgmr.msra.gmra.mxu0 %v18_v12 }
  0xe2   :  { %v117_v18 = vpop.f32.mrf.mxu0 }
  0xe3   :  { %v123_v19 = vmul.f32 0.5, %v117_v18 }
  0xe4   :  { %v312_v20 = vpop.f32.mrf.mxu0 }
  0xe5   :  { %v124_v21 = vfloor.f32 %v123_v19 }
  0xe6   :  { %v120_v22 = vpop.f32.mrf.mxu0 }
  0xe7   :  { %v125_v23 = vmul.f32 2.0, %v124_v21 }
  0xe8   :  { %v313_v24 = vpop.f32.mrf.mxu0 }
  0xe9   :  { %v126_v25 = vsub.f32 %v117_v18, %v125_v23 }
  0xeb   :  { %v127_v26 = vmul.f32 2.0, %v126_v25  ;;  %247 = vst [vmem:[%s453_s4] sm:$0xff] %v126_v25 }
  0xed   :  { %v128_v28 = vsub.f32 1.0, %v127_v26 }
  0xef   :  { %v130_v29 = vadd.f32 %v129_v27, %v128_v28 }
  0xf1   :  { %v131_v30 = vmul.f32 %v130_v29, %v128_v28 }
  0xf3   :  { %251 = vst [vmem:[%s453_s4 + $0x18] sm:$0xff] %v131_v30  ;;  %v132_v31 = vmul.f32 %v131_v30, %v128_v28 }
  0xf5   :  { %vm133_vm1 = vcmp.lt.f32.partialorder %v132_v31, 0.0  ;;  %248 = vst [vmem:[%s453_s4 + $0x8] sm:$0xff] %v132_v31  ;;  %v249_v32 = vand.u32 2147483647, %v132_v31 }
  0xf6   :  { %vm274_vm2 = vmpackc.low %vm133_vm1, %vm133_vm1 }
  0xf7   :  { %331 = vmatmul.mubr.msk.bf16.vlgmr.msra.gmra.mxu1 %vm274_vm2, %v355_v33  ;;  %250 = vst [vmem:[%s453_s4 + $0x10] sm:$0xff] %v249_v32 }
 0x1b7   :  { %v235_v34 = vpop.f32.mrf.mxu1 }
 0x1b8   :  { %v241_v35 = vmul.f32 0.5, %v235_v34 }
 0x1b9   :  { %v332_v36 = vpop.f32.mrf.mxu1 }
 0x1ba   :  { %v242_v37 = vfloor.f32 %v241_v35 }
 0x1bb   :  { %v238_v38 = vpop.f32.mrf.mxu1 }
 0x1bc   :  { %v243_v39 = vmul.f32 2.0, %v242_v37 }
 0x1bd   :  { %v333_v40 = vpop.f32.mrf.mxu1 }
 0x1be   :  { %v244_v41 = vsub.f32 %v235_v34, %v243_v39 }
 0x1c0   :  { %v245_v42 = vmul.f32 2.0, %v244_v41 }
 0x1c2   :  { %v246_v43 = vsub.f32 1.0, %v245_v42 }
 0x1c4   :  { %252 = vst [vmem:[%s453_s4 + $0x20] sm:$0xff] %v246_v43 }

</bundles_post_ra>
